<compile_context>
chip_gen: v5e
topology: v5e:2x2
jax: 0.10.0
libtpu: 0.0.40
codegen_flags: <defaults>
</compile_context>

<pallas_src>
import jax
import jax.numpy as jnp
from jax.experimental import pallas as pl
from jax.experimental.pallas import tpu as pltpu


def _round_up(x: int, m: int) -> int:
    return ((x + m - 1) // m) * m


def _mutation_head_kernel(x_ref, w1_ref, b1_ref, w2_ref, b2_ref, o_ref):
    """Fused head: o = relu(x @ w1 + b1) @ w2 + b2 (all in VMEM, one pass)."""
    x = x_ref[...]
    h = jnp.dot(x, w1_ref[...], preferred_element_type=jnp.float32) + b1_ref[...]
    h = jnp.maximum(h, 0.0)                       # torch.nn.ReLU
    y = jnp.dot(h, w2_ref[...], preferred_element_type=jnp.float32) + b2_ref[...]
    o_ref[...] = y.astype(o_ref.dtype)


# ---------------------------------------------------------------------------
# Parameter init (matches torch.nn.Linear default U(-1/sqrt(in), 1/sqrt(in)))
# ---------------------------------------------------------------------------
def init_mutation_head_params(key, dim):
    k1w, k1b, k2w, k2b = jax.random.split(key, 4)
    bound = 1.0 / jnp.sqrt(jnp.float32(dim))
    w1 = jax.random.uniform(k1w, (dim, dim), jnp.float32, minval=-bound, maxval=bound)
    b1 = jax.random.uniform(k1b, (dim,), jnp.float32, minval=-bound, maxval=bound)
    w2 = jax.random.uniform(k2w, (1, dim), jnp.float32, minval=-bound, maxval=bound)
    b2 = jax.random.uniform(k2b, (1,), jnp.float32, minval=-bound, maxval=bound)
    return {"linear": (w1, b1), "final": (w2, b2)}


def prepare_head_params(params, *, lane=128):
    """One-time layout prep: transpose to [in, out] and pad last dims to 128."""
    w1, b1 = params["linear"]
    w2, b2 = params["final"]
    dim = w1.shape[1]
    out = w2.shape[0]                      # = 1
    dim_p = _round_up(dim, lane)
    out_p = _round_up(out, lane)           # 1 -> 128 (lane-dense output)
    w1_t = jnp.zeros((dim_p, dim_p), jnp.float32).at[:dim, :dim].set(w1.T)
    b1_p = jnp.zeros((1, dim_p), jnp.float32).at[0, :dim].set(b1)
    w2_t = jnp.zeros((dim_p, out_p), jnp.float32).at[:dim, :out].set(w2.T)
    b2_p = jnp.zeros((1, out_p), jnp.float32).at[0, :out].set(b2)
    return {"w1_t": w1_t, "b1": b1_p, "w2_t": w2_t, "b2": b2_p,
            "dim": dim, "out": out}


# ---------------------------------------------------------------------------
# Forward pass (mirrors MutationPredictionModel.forward after the esm1b 'vec')
# ---------------------------------------------------------------------------
def mutation_head_forward(prepped, vec):
    """vec: [B, dim] pooled ESM-1b representation. Returns [B, 1]."""
    B, dim = vec.shape
    dim_p = prepped["w1_t"].shape[0]
    out_p = prepped["w2_t"].shape[1]

    # Batch tile: sublane-aligned (8 for f32); cap at 128 rows per grid step.
    tb = min(128, _round_up(max(B, 1), 8))
    Bp = _round_up(max(B, 1), tb)
    num_b = Bp // tb

    # Glue: zero-pad the activation to the lane/sublane-dense slab.
    x_p = jnp.zeros((Bp, dim_p), jnp.float32).at[:B, :dim].set(vec)

    flops = 2 * Bp * dim_p * dim_p + 2 * Bp * dim_p * out_p
    bytes_accessed = 4 * (Bp * dim_p + dim_p * dim_p + dim_p
                          + dim_p * out_p + out_p + Bp * out_p)
    block_bytes = 4 * (tb * dim_p + dim_p * dim_p + dim_p
                       + dim_p * out_p + out_p + tb * out_p)
    vmem_limit = int(min(max(2 * block_bytes + (8 << 20), 16 << 20), 48 << 20))

    out_padded = pl.pallas_call(
        _mutation_head_kernel,
        out_shape=jax.ShapeDtypeStruct((Bp, out_p), jnp.float32),
        grid=(num_b,),
        in_specs=[
            pl.BlockSpec((tb, dim_p), lambda i: (i, 0)),       # x tile (pipelined)
            pl.BlockSpec((dim_p, dim_p), lambda i: (0, 0)),    # w1 resident
            pl.BlockSpec((1, dim_p), lambda i: (0, 0)),        # b1 resident
            pl.BlockSpec((dim_p, out_p), lambda i: (0, 0)),    # w2 resident
            pl.BlockSpec((1, out_p), lambda i: (0, 0)),        # b2 resident
        ],
        out_specs=pl.BlockSpec((tb, out_p), lambda i: (i, 0)),
        compiler_params=pltpu.CompilerParams(
            dimension_semantics=("parallel",),     # shard batch tiles across v7x TCs
            vmem_limit_bytes=vmem_limit,
        ),
        cost_estimate=pl.CostEstimate(
            flops=flops, transcendentals=0, bytes_accessed=bytes_accessed),
    )(x_p, prepped["w1_t"], prepped["b1"], prepped["w2_t"], prepped["b2"])

    # Strip batch / output-lane padding.
    return out_padded[:B, :prepped["out"]]


# ---------------------------------------------------------------------------
# Pure-JAX reference (unpadded, straight from the PyTorch forward)
# ---------------------------------------------------------------------------
def _reference_forward(params, vec):
    w1, b1 = params["linear"]
    w2, b2 = params["final"]
    x = jnp.maximum(vec @ w1.T + b1, 0.0)
    return x @ w2.T + b2


if __name__ == "__main__":
    key = jax.random.PRNGKey(0)
    k_params, k_in = jax.random.split(key)

    batch = 2
    dim = 256   # small stand-in for ESM-1b embed_dim (1280); multiple of 128

    params = init_mutation_head_params(k_params, dim)
    prepped = prepare_head_params(params)
    vec = jax.random.normal(k_in, (batch, dim), jnp.float32)

    out = mutation_head_forward(prepped, vec)
    out = jax.block_until_ready(out)

    ref = _reference_forward(params, vec)
    assert out.shape == (batch, 1), out.shape
    assert jnp.allclose(out, ref, atol=1e-4, rtol=1e-4), "mismatch vs reference"

    print("KERNEL_OK")
</pallas_src>

<mosaic_0001>
module attributes {stable_mosaic.version = 11 : i64} {
  func.func @_mutation_head_kernel(%arg0: i32, %arg1: memref<8x256xf32, #tpu.memory_space<vmem>>, %arg2: memref<256x256xf32, #tpu.memory_space<vmem>>, %arg3: memref<1x256xf32, #tpu.memory_space<vmem>>, %arg4: memref<256x128xf32, #tpu.memory_space<vmem>>, %arg5: memref<1x128xf32, #tpu.memory_space<vmem>>, %arg6: memref<8x128xf32, #tpu.memory_space<vmem>>) attributes {dimension_semantics = [#tpu.dimension_semantics<parallel>], iteration_bounds = array<i64: 1>, scalar_prefetch = 0 : i64, scratch_operands = 0 : i64, tpu.core_type = #tpu.core_type<tc>, window_params = [{transform_indices = @transform_0, window_bounds = array<i64: 8, 256>}, {pipeline_mode = #tpu.pipeline_mode<synchronous>, transform_indices = @transform_1, window_bounds = array<i64: 256, 256>}, {pipeline_mode = #tpu.pipeline_mode<synchronous>, transform_indices = @transform_2, window_bounds = array<i64: 1, 256>}, {pipeline_mode = #tpu.pipeline_mode<synchronous>, transform_indices = @transform_3, window_bounds = array<i64: 256, 128>}, {pipeline_mode = #tpu.pipeline_mode<synchronous>, transform_indices = @transform_4, window_bounds = array<i64: 1, 128>}, {transform_indices = @transform_5, window_bounds = array<i64: 8, 128>}]} {
    %c0 = arith.constant 0 : index
    %c0_0 = arith.constant 0 : index
    %0 = vector.load %arg1[%c0, %c0_0] : memref<8x256xf32, #tpu.memory_space<vmem>>, vector<8x256xf32>
    %c0_1 = arith.constant 0 : index
    %c0_2 = arith.constant 0 : index
    %1 = vector.load %arg2[%c0_1, %c0_2] : memref<256x256xf32, #tpu.memory_space<vmem>>, vector<256x256xf32>
    %cst = arith.constant dense<0.000000e+00> : vector<8x256xf32>
    %2 = tpu.matmul %0, %1, %cst {dimension_numbers = #tpu.dot_dimension_numbers<[1], [0], [0], [1], [0, 0, 1, 1], [], []>} : vector<8x256xf32>, vector<256x256xf32>, vector<8x256xf32> -> vector<8x256xf32>
    %c0_3 = arith.constant 0 : index
    %c0_4 = arith.constant 0 : index
    %3 = vector.load %arg3[%c0_3, %c0_4] : memref<1x256xf32, #tpu.memory_space<vmem>>, vector<1x256xf32>
    %4 = vector.broadcast %3 : vector<1x256xf32> to vector<8x256xf32>
    %5 = arith.addf %2, %4 : vector<8x256xf32>
    %cst_5 = arith.constant 0.000000e+00 : f32
    %6 = vector.broadcast %cst_5 : f32 to vector<8x256xf32>
    %7 = arith.maximumf %5, %6 : vector<8x256xf32>
    %c0_6 = arith.constant 0 : index
    %c0_7 = arith.constant 0 : index
    %8 = vector.load %arg4[%c0_6, %c0_7] : memref<256x128xf32, #tpu.memory_space<vmem>>, vector<256x128xf32>
    %cst_8 = arith.constant dense<0.000000e+00> : vector<8x128xf32>
    %9 = tpu.matmul %7, %8, %cst_8 {dimension_numbers = #tpu.dot_dimension_numbers<[1], [0], [0], [1], [0, 0, 1, 1], [], []>} : vector<8x256xf32>, vector<256x128xf32>, vector<8x128xf32> -> vector<8x128xf32>
    %c0_9 = arith.constant 0 : index
    %c0_10 = arith.constant 0 : index
    %10 = vector.load %arg5[%c0_9, %c0_10] : memref<1x128xf32, #tpu.memory_space<vmem>>, vector<1x128xf32>
    %11 = vector.broadcast %10 : vector<1x128xf32> to vector<8x128xf32>
    %12 = arith.addf %9, %11 : vector<8x128xf32>
    %c0_11 = arith.constant 0 : index
    %c0_12 = arith.constant 0 : index
    %13 = vector.load %arg6[%c0_11, %c0_12] : memref<8x128xf32, #tpu.memory_space<vmem>>, vector<8x128xf32>
    tpu.vector_store %arg6[%c0_11, %c0_12], %12 {strides = array<i32>} : memref<8x128xf32, #tpu.memory_space<vmem>>, vector<8x128xf32>,
    return
  }
  func.func @transform_0(%arg0: i32) -> (i32, i32) {
    %c0_i32 = arith.constant 0 : i32
    %c0_i32_0 = arith.constant 0 : i32
    return %arg0, %c0_i32 : i32, i32
  }
  func.func @transform_1(%arg0: i32) -> (i32, i32) {
    %c0_i32 = arith.constant 0 : i32
    %c0_i32_0 = arith.constant 0 : i32
    %c0_i32_1 = arith.constant 0 : i32
    return %c0_i32, %c0_i32_0 : i32, i32
  }
  func.func @transform_2(%arg0: i32) -> (i32, i32) {
    %c0_i32 = arith.constant 0 : i32
    %c0_i32_0 = arith.constant 0 : i32
    %c0_i32_1 = arith.constant 0 : i32
    return %c0_i32, %c0_i32_0 : i32, i32
  }
  func.func @transform_3(%arg0: i32) -> (i32, i32) {
    %c0_i32 = arith.constant 0 : i32
    %c0_i32_0 = arith.constant 0 : i32
    %c0_i32_1 = arith.constant 0 : i32
    return %c0_i32, %c0_i32_0 : i32, i32
  }
  func.func @transform_4(%arg0: i32) -> (i32, i32) {
    %c0_i32 = arith.constant 0 : i32
    %c0_i32_0 = arith.constant 0 : i32
    %c0_i32_1 = arith.constant 0 : i32
    return %c0_i32, %c0_i32_0 : i32, i32
  }
  func.func @transform_5(%arg0: i32) -> (i32, i32) {
    %c0_i32 = arith.constant 0 : i32
    %c0_i32_0 = arith.constant 0 : i32
    return %arg0, %c0_i32 : i32, i32
  }
}

</mosaic_0001>

<bundles_post_ra>
// kernel: tpu_custom_call.1
= control target key start
LH: loop header
LB: loop body
LE: loop exit
PB: predicated region body
PF: predicated region fallthrough
CT: control target
= control target key end

     0   :  { %10 = vsyncpa [#allocation3], 0  ;;  %s525_s0 = inlined_call_operand.hbm [shape: f32[8,256], index: 0, kind: input, shape index: {}]   ;;  %s526_s1 = inlined_call_operand.hbm [shape: f32[256,256], index: 1, kind: input, shape index: {}]   ;;  %s527_s2 = inlined_call_operand.hbm [shape: f32[1,256], index: 2, kind: input, shape index: {}]   ;;  %s528_s3 = inlined_call_operand.hbm [shape: f32[256,128], index: 3, kind: input, shape index: {}]   ;;  %s529_s4 = inlined_call_operand.vmem [shape: f32[1,128], index: 4, kind: input, shape index: {}]   ;;  %s530_s5 = inlined_call_operand.hbm [shape: f32[8,128], index: 5, kind: output, shape index: {}]  }
   0x1   :  { %11 = vsyncpa [#allocation6], 0 }
   0x2   :  { %12 = vsyncpa [#allocation9], 0  ;;  %s29_s20 = sshll.u32 %s526_s1, 4  ;;  %s30_s20 = int_to_ptr.hbm [resolvable:$true] %s29_s20 }
   0x3   :  { %13 = vsyncpa [#allocation4], 0  ;;  %s468_s21 = smov [#allocation5]   ;;  %s19_s25 = sshll.u32 %s525_s0, 4  ;;  %s20_s25 = int_to_ptr.hbm [resolvable:$true] %s19_s25 }
   0x4   :  { %s31_s22 = sshll.u32 %s468_s21, 4  ;;  %s469_s26 = smov 256   ;;  %s32_s22 = int_to_ptr.vmem [resolvable:$true] %s31_s22 }
   0x5   :  { %s470_s27 = smov 16   ;;  %s471_s28 = smov [#allocation2]  }
   0x6   :  { %37 = dma.hbm_to_vmem [thread:$0]  %s30_s20, 8192, %s32_s22, [#allocation6], %s469_s26, %s469_s26, %s470_s27  }
   0x7   :  { %s21_s29 = sshll.u32 %s471_s28, 4  ;;  %s43_s7 = sshll.u32 %s527_s2, 4  ;;  %s22_s29 = int_to_ptr.vmem [resolvable:$true] %s21_s29  ;;  %s44_s7 = int_to_ptr.hbm [resolvable:$true] %s43_s7 }
   0x8   :  { %24 = dma.hbm_to_vmem [thread:$0]  %s20_s25, 256, %s22_s29, [#allocation3]  }
   0x9   :  { %s53_s9 = sshll.u32 %s528_s3, 4  ;;  %s472_s10 = smov [#allocation7]   ;;  %s54_s9 = int_to_ptr.hbm [resolvable:$true] %s53_s9 }
   0xa   :  { %s45_s11 = sshll.u32 %s472_s10, 4  ;;  %s473_s0 = smov [#allocation8]   ;;  %s46_s11 = int_to_ptr.vmem [resolvable:$true] %s45_s11 }
   0xb   :  { %48 = dma.hbm_to_vmem [thread:$0]  %s44_s7, 32, %s46_s11, [#allocation6]  }
   0xc   :  { %s55_s12 = sshll.u32 %s473_s0, 4  ;;  %s474_s13 = smov 128   ;;  %s56_s12 = int_to_ptr.vmem [resolvable:$true] %s55_s12 }
   0xd   :  { %s475_s14 = smov 8  }
   0xe   :  { %61 = dma.hbm_to_vmem [thread:$0]  %s54_s9, 4096, %s56_s12, [#allocation9], %s474_s13, %s474_s13, %s475_s14  }
   0xf   :  { %460 = dma.done.wait [#allocation3], 256  }
  0x10   :  { %461 = vsyncadd [#allocation3], 4294967040 }
  0x11   :  { %462 = dma.done.wait [#allocation6], 8224  }
  0x12   :  { %463 = vsyncadd [#allocation6], 4294959072 }
  0x13   :  { %464 = dma.done.wait [#allocation9], 4096  }
  0x14   :  { %465 = vsyncadd [#allocation9], 4294963200  ;;  %v113_v0 = vld [vmem:[#allocation5 + $0xf8] sm:$0xff]  ;;  %v111_v1 = vld [vmem:[#allocation5 + $0xe8] sm:$0xff]  ;;  %s476_s15 = smov [#allocation10]   ;;  %s318_s19 = sshll.u32 %s530_s5, 4  ;;  %s319_s19 = int_to_ptr.hbm [resolvable:$true] %s318_s19 }
  0x15   :  { %v145_v2 = vld [vmem:[#allocation5 + $0x1f8] sm:$0xff]  ;;  %192 = vmatpush.msra.mxu2 %v113_v0  ;;  %v112_v3 = vld [vmem:[#allocation5 + $0xf0] sm:$0xff]  ;;  %v143_v4 = vld [vmem:[#allocation5 + $0x1e8] sm:$0xff]  ;;  %s316_s16 = sshll.u32 %s476_s15, 4  ;;  %s317_s16 = int_to_ptr.vmem [resolvable:$true] %s316_s16 }
  0x16   :  { %212 = vmatpush.msra.mxu3 %v145_v2  ;;  %152 = vmatpush.msra.mxu0 %v112_v3  ;;  %v109_v5 = vld [vmem:[#allocation5 + $0xd8] sm:$0xff]  ;;  %v110_v6 = vld [vmem:[#allocation5 + $0xe0] sm:$0xff]  ;;  %v144_v7 = vld [vmem:[#allocation5 + $0x1f0] sm:$0xff] }
  0x17   :  { %193 = vmatpush.msra.mxu2 %v111_v1  ;;  %v141_v8 = vld [vmem:[#allocation5 + $0x1d8] sm:$0xff]  ;;  %v108_v9 = vld [vmem:[#allocation5 + $0xd0] sm:$0xff]  ;;  %v142_v10 = vld [vmem:[#allocation5 + $0x1e0] sm:$0xff]  ;;  %172 = vmatpush.msra.mxu1 %v144_v7 }
  0x18   :  { %213 = vmatpush.msra.mxu3 %v143_v4  ;;  %153 = vmatpush.msra.mxu0 %v110_v6  ;;  %v107_v11 = vld [vmem:[#allocation5 + $0xc8] sm:$0xff]  ;;  %v106_v13 = vld [vmem:[#allocation5 + $0xc0] sm:$0xff]  ;;  %v140_v14 = vld [vmem:[#allocation5 + $0x1d0] sm:$0xff] }
  0x19   :  { %v139_v12 = vld [vmem:[#allocation5 + $0x1c8] sm:$0xff]  ;;  %194 = vmatpush.msra.mxu2 %v109_v5  ;;  %173 = vmatpush.msra.mxu1 %v142_v10  ;;  %v105_v15 = vld [vmem:[#allocation5 + $0xb8] sm:$0xff]  ;;  %v104_v17 = vld [vmem:[#allocation5 + $0xb0] sm:$0xff] }
  0x1a   :  { %214 = vmatpush.msra.mxu3 %v141_v8  ;;  %154 = vmatpush.msra.mxu0 %v108_v9  ;;  %v137_v16 = vld [vmem:[#allocation5 + $0x1b8] sm:$0xff]  ;;  %v138_v18 = vld [vmem:[#allocation5 + $0x1c0] sm:$0xff]  ;;  %v103_v19 = vld [vmem:[#allocation5 + $0xa8] sm:$0xff] }
  0x1b   :  { %195 = vmatpush.msra.mxu2 %v107_v11  ;;  %174 = vmatpush.msra.mxu1 %v140_v14  ;;  %v135_v20 = vld [vmem:[#allocation5 + $0x1a8] sm:$0xff]  ;;  %v102_v21 = vld [vmem:[#allocation5 + $0xa0] sm:$0xff]  ;;  %v136_v22 = vld [vmem:[#allocation5 + $0x1b0] sm:$0xff] }
  0x1c   :  { %215 = vmatpush.msra.mxu3 %v139_v12  ;;  %155 = vmatpush.msra.mxu0 %v106_v13  ;;  %v101_v23 = vld [vmem:[#allocation5 + $0x98] sm:$0xff]  ;;  %v100_v25 = vld [vmem:[#allocation5 + $0x90] sm:$0xff]  ;;  %v134_v26 = vld [vmem:[#allocation5 + $0x1a0] sm:$0xff] }
  0x1d   :  { %196 = vmatpush.msra.mxu2 %v105_v15  ;;  %175 = vmatpush.msra.mxu1 %v138_v18  ;;  %v133_v24 = vld [vmem:[#allocation5 + $0x198] sm:$0xff]  ;;  %v99_v27 = vld [vmem:[#allocation5 + $0x88] sm:$0xff]  ;;  %v98_v29 = vld [vmem:[#allocation5 + $0x80] sm:$0xff] }
  0x1e   :  { %216 = vmatpush.msra.mxu3 %v137_v16  ;;  %156 = vmatpush.msra.mxu0 %v104_v17  ;;  %v131_v28 = vld [vmem:[#allocation5 + $0x188] sm:$0xff]  ;;  %v132_v30 = vld [vmem:[#allocation5 + $0x190] sm:$0xff]  ;;  %v97_v31 = vld [vmem:[#allocation5 + $0x78] sm:$0xff] }
  0x1f   :  { %197 = vmatpush.msra.mxu2 %v103_v19  ;;  %176 = vmatpush.msra.mxu1 %v136_v22  ;;  %v129_v32 = vld [vmem:[#allocation5 + $0x178] sm:$0xff]  ;;  %v96_v33 = vld [vmem:[#allocation5 + $0x70] sm:$0xff]  ;;  %v130_v34 = vld [vmem:[#allocation5 + $0x180] sm:$0xff] }
  0x20   :  { %217 = vmatpush.msra.mxu3 %v135_v20  ;;  %157 = vmatpush.msra.mxu0 %v102_v21  ;;  %v95_v35 = vld [vmem:[#allocation5 + $0x68] sm:$0xff]  ;;  %v94_v37 = vld [vmem:[#allocation5 + $0x60] sm:$0xff]  ;;  %v128_v38 = vld [vmem:[#allocation5 + $0x170] sm:$0xff] }
  0x21   :  { %198 = vmatpush.msra.mxu2 %v101_v23  ;;  %177 = vmatpush.msra.mxu1 %v134_v26  ;;  %v127_v36 = vld [vmem:[#allocation5 + $0x168] sm:$0xff]  ;;  %v93_v39 = vld [vmem:[#allocation5 + $0x58] sm:$0xff]  ;;  %v92_v41 = vld [vmem:[#allocation5 + $0x50] sm:$0xff] }
  0x22   :  { %218 = vmatpush.msra.mxu3 %v133_v24  ;;  %158 = vmatpush.msra.mxu0 %v100_v25  ;;  %v125_v40 = vld [vmem:[#allocation5 + $0x158] sm:$0xff]  ;;  %v126_v42 = vld [vmem:[#allocation5 + $0x160] sm:$0xff]  ;;  %v91_v43 = vld [vmem:[#allocation5 + $0x48] sm:$0xff] }
  0x23   :  { %199 = vmatpush.msra.mxu2 %v99_v27  ;;  %178 = vmatpush.msra.mxu1 %v132_v30  ;;  %v123_v44 = vld [vmem:[#allocation5 + $0x148] sm:$0xff]  ;;  %v90_v45 = vld [vmem:[#allocation5 + $0x40] sm:$0xff]  ;;  %v124_v46 = vld [vmem:[#allocation5 + $0x150] sm:$0xff] }
  0x24   :  { %219 = vmatpush.msra.mxu3 %v131_v28  ;;  %159 = vmatpush.msra.mxu0 %v98_v29  ;;  %v89_v47 = vld [vmem:[#allocation5 + $0x38] sm:$0xff]  ;;  %v88_v49 = vld [vmem:[#allocation5 + $0x30] sm:$0xff]  ;;  %v122_v50 = vld [vmem:[#allocation5 + $0x140] sm:$0xff] }
  0x25   :  { %200 = vmatpush.msra.mxu2 %v97_v31  ;;  %179 = vmatpush.msra.mxu1 %v130_v34  ;;  %v121_v48 = vld [vmem:[#allocation5 + $0x138] sm:$0xff]  ;;  %v87_v51 = vld [vmem:[#allocation5 + $0x28] sm:$0xff]  ;;  %v86_v53 = vld [vmem:[#allocation5 + $0x20] sm:$0xff] }
  0x26   :  { %220 = vmatpush.msra.mxu3 %v129_v32  ;;  %160 = vmatpush.msra.mxu0 %v96_v33  ;;  %v119_v52 = vld [vmem:[#allocation5 + $0x128] sm:$0xff]  ;;  %v120_v54 = vld [vmem:[#allocation5 + $0x130] sm:$0xff]  ;;  %v85_v55 = vld [vmem:[#allocation5 + $0x18] sm:$0xff] }
  0x27   :  { %201 = vmatpush.msra.mxu2 %v95_v35  ;;  %180 = vmatpush.msra.mxu1 %v128_v38  ;;  %v117_v56 = vld [vmem:[#allocation5 + $0x118] sm:$0xff]  ;;  %v84_v57 = vld [vmem:[#allocation5 + $0x10] sm:$0xff]  ;;  %v118_v58 = vld [vmem:[#allocation5 + $0x120] sm:$0xff] }
  0x28   :  { %221 = vmatpush.msra.mxu3 %v127_v36  ;;  %161 = vmatpush.msra.mxu0 %v94_v37  ;;  %v83_v59 = vld [vmem:[#allocation5 + $0x8] sm:$0xff]  ;;  %v80_v61 = vld [vmem:[#allocation2] sm:$0xff]  ;;  %v81_v62 = vld [vmem:[#allocation2 + $0x8] sm:$0xff] }
  0x29   :  { %202 = vmatpush.msra.mxu2 %v93_v39  ;;  %181 = vmatpush.msra.mxu1 %v126_v42  ;;  %v115_v60 = vld [vmem:[#allocation5 + $0x108] sm:$0xff]  ;;  %v82_v63 = vld [vmem:[#allocation5] sm:$0xff]  ;;  %v116_v0 = vld [vmem:[#allocation5 + $0x110] sm:$0xff] }
  0x2a   :  { %222 = vmatpush.msra.mxu3 %v125_v40  ;;  %162 = vmatpush.msra.mxu0 %v92_v41  ;;  %v114_v1 = vld [vmem:[#allocation5 + $0x100] sm:$0xff]  ;;  %v248_v3 = vld [vmem:[#allocation8 + $0x70] sm:$0xff]  ;;  %v247_v5 = vld [vmem:[#allocation8 + $0x68] sm:$0xff] }
  0x2b   :  { %203 = vmatpush.msra.mxu2 %v91_v43  ;;  %182 = vmatpush.msra.mxu1 %v124_v46  ;;  %v249_v2 = vld [vmem:[#allocation8 + $0x78] sm:$0xff]  ;;  %v264_v6 = vld [vmem:[#allocation8 + $0xf0] sm:$0xff]  ;;  %v246_v7 = vld [vmem:[#allocation8 + $0x60] sm:$0xff] }
  0x2c   :  { %223 = vmatpush.msra.mxu3 %v123_v44  ;;  %163 = vmatpush.msra.mxu0 %v90_v45  ;;  %v265_v4 = vld [vmem:[#allocation8 + $0xf8] sm:$0xff]  ;;  %v263_v8 = vld [vmem:[#allocation8 + $0xe8] sm:$0xff]  ;;  %v262_v10 = vld [vmem:[#allocation8 + $0xe0] sm:$0xff] }
  0x2d   :  { %204 = vmatpush.msra.mxu2 %v89_v47  ;;  %183 = vmatpush.msra.mxu1 %v122_v50  ;;  %v245_v9 = vld [vmem:[#allocation8 + $0x58] sm:$0xff]  ;;  %v244_v11 = vld [vmem:[#allocation8 + $0x50] sm:$0xff]  ;;  %v243_v13 = vld [vmem:[#allocation8 + $0x48] sm:$0xff] }
  0x2e   :  { %224 = vmatpush.msra.mxu3 %v121_v48  ;;  %164 = vmatpush.msra.mxu0 %v88_v49  ;;  %v261_v12 = vld [vmem:[#allocation8 + $0xd8] sm:$0xff]  ;;  %v260_v14 = vld [vmem:[#allocation8 + $0xd0] sm:$0xff]  ;;  %v242_v15 = vld [vmem:[#allocation8 + $0x40] sm:$0xff] }
  0x2f   :  { %205 = vmatpush.msra.mxu2 %v87_v51  ;;  %184 = vmatpush.msra.mxu1 %v120_v54  ;;  %v259_v16 = vld [vmem:[#allocation8 + $0xc8] sm:$0xff]  ;;  %v241_v17 = vld [vmem:[#allocation8 + $0x38] sm:$0xff]  ;;  %v258_v18 = vld [vmem:[#allocation8 + $0xc0] sm:$0xff] }
  0x30   :  { %225 = vmatpush.msra.mxu3 %v119_v52  ;;  %165 = vmatpush.msra.mxu0 %v86_v53  ;;  %v240_v19 = vld [vmem:[#allocation8 + $0x30] sm:$0xff]  ;;  %v257_v20 = vld [vmem:[#allocation8 + $0xb8] sm:$0xff]  ;;  %v239_v21 = vld [vmem:[#allocation8 + $0x28] sm:$0xff] }
  0x31   :  { %206 = vmatpush.msra.mxu2 %v85_v55  ;;  %185 = vmatpush.msra.mxu1 %v118_v58  ;;  %v256_v22 = vld [vmem:[#allocation8 + $0xb0] sm:$0xff]  ;;  %v238_v23 = vld [vmem:[#allocation8 + $0x20] sm:$0xff]  ;;  %v255_v24 = vld [vmem:[#allocation8 + $0xa8] sm:$0xff] }
  0x32   :  { %226 = vmatpush.msra.mxu3 %v117_v56  ;;  %166 = vmatpush.msra.mxu0 %v84_v57  ;;  %v237_v25 = vld [vmem:[#allocation8 + $0x18] sm:$0xff]  ;;  %v254_v26 = vld [vmem:[#allocation8 + $0xa0] sm:$0xff]  ;;  %v236_v27 = vld [vmem:[#allocation8 + $0x10] sm:$0xff] }
  0x33   :  { %207 = vmatpush.msra.mxu2 %v83_v59  ;;  %186 = vmatpush.msra.mxu1 %v116_v0  ;;  %v253_v28 = vld [vmem:[#allocation8 + $0x98] sm:$0xff]  ;;  %v235_v29 = vld [vmem:[#allocation8 + $0x8] sm:$0xff]  ;;  %v252_v30 = vld [vmem:[#allocation8 + $0x90] sm:$0xff] }
  0x34   :  { %227 = vmatpush.msra.mxu3 %v115_v60  ;;  %208 = vmatmul.f32.vlgmr.msra.gmra.mxu2 %v80_v61  ;;  %v234_v31 = vld [vmem:[#allocation8] sm:$0xff]  ;;  %v251_v32 = vld [vmem:[#allocation8 + $0x88] sm:$0xff]  ;;  %v146_v34 = vld [vmem:[#allocation7] sm:$0x3] }
  0x35   :  { %228 = vmatmul.f32.vlgmr.msra.gmra.mxu3 %v81_v62  ;;  %167 = vmatpush.msra.mxu0 %v82_v63  ;;  %v250_v33 = vld [vmem:[#allocation8 + $0x80] sm:$0xff]  ;;  %v148_v35 = vperm.slane %v146_v34, 0  ;;  %v149_v38 = vperm.slane %v146_v34, 1  ;;  %v339_v47 = vld [vmem:[%s529_s4] ss:$0 sm:$0xff] }
  0x36   :  { %168 = vmatmul.f32.vlgmr.msra.gmra.mxu0 %v80_v61  ;;  %187 = vmatpush.msra.mxu1 %v114_v1 }
  0x37   :  { %270 = vmatpush.msrb.mxu0 %v249_v2  ;;  %188 = vmatmul.f32.vlgmr.msra.gmra.mxu1 %v81_v62 }
  0x38   :  { %290 = vmatpush.msrb.mxu1 %v265_v4 }
  0x39   :  { %271 = vmatpush.msrb.mxu0 %v248_v3 }
  0x3a   :  { %291 = vmatpush.msrb.mxu1 %v264_v6 }
  0x3b   :  { %272 = vmatpush.msrb.mxu0 %v247_v5 }
  0x3c   :  { %292 = vmatpush.msrb.mxu1 %v263_v8 }
  0x3d   :  { %273 = vmatpush.msrb.mxu0 %v246_v7 }
  0x3e   :  { %293 = vmatpush.msrb.mxu1 %v262_v10 }
  0x3f   :  { %274 = vmatpush.msrb.mxu0 %v245_v9 }
  0x40   :  { %294 = vmatpush.msrb.mxu1 %v261_v12 }
  0x41   :  { %275 = vmatpush.msrb.mxu0 %v244_v11 }
  0x42   :  { %295 = vmatpush.msrb.mxu1 %v260_v14 }
  0x43   :  { %276 = vmatpush.msrb.mxu0 %v243_v13 }
  0x44   :  { %296 = vmatpush.msrb.mxu1 %v259_v16 }
  0x45   :  { %277 = vmatpush.msrb.mxu0 %v242_v15 }
  0x46   :  { %297 = vmatpush.msrb.mxu1 %v258_v18 }
  0x47   :  { %278 = vmatpush.msrb.mxu0 %v241_v17 }
  0x48   :  { %298 = vmatpush.msrb.mxu1 %v257_v20 }
  0x49   :  { %279 = vmatpush.msrb.mxu0 %v240_v19 }
  0x4a   :  { %299 = vmatpush.msrb.mxu1 %v256_v22 }
  0x4b   :  { %280 = vmatpush.msrb.mxu0 %v239_v21 }
  0x4c   :  { %300 = vmatpush.msrb.mxu1 %v255_v24 }
  0x4d   :  { %281 = vmatpush.msrb.mxu0 %v238_v23 }
  0x4e   :  { %301 = vmatpush.msrb.mxu1 %v254_v26 }
  0x4f   :  { %282 = vmatpush.msrb.mxu0 %v237_v25 }
  0x50   :  { %302 = vmatpush.msrb.mxu1 %v253_v28 }
  0x51   :  { %283 = vmatpush.msrb.mxu0 %v236_v27 }
  0x52   :  { %303 = vmatpush.msrb.mxu1 %v252_v30 }
  0x53   :  { %284 = vmatpush.msrb.mxu0 %v235_v29 }
  0x54   :  { %304 = vmatpush.msrb.mxu1 %v251_v32 }
  0x55   :  { %285 = vmatpush.msrb.mxu0 %v234_v31 }
  0x56   :  { %305 = vmatpush.msrb.mxu1 %v250_v33 }
  0xb3   :  { %v169_v36 = vpop.f32.mrf.mxu0 }
  0xb4   :  { %v170_v37 = vadd.f32 %v169_v36, %v148_v35  ;;  %v189_v39 = vpop.f32.mrf.mxu1 }
  0xb6   :  { %v190_v40 = vadd.f32 %v189_v39, %v170_v37 }
  0xb7   :  { %v209_v41 = vpop.f32.mrf.mxu2 }
  0xb8   :  { %v229_v42 = vpop.f32.mrf.mxu3  ;;  %v232_v43 = vmax.f32 %v190_v40, 0.0  ;;  %v210_v44 = vadd.f32 %v209_v41, %v149_v38 }
  0xba   :  { %v230_v45 = vadd.f32 %v229_v42, %v210_v44  ;;  %286 = vmatmul.f32.vlgmr.msrb.gmra.mxu0 %v232_v43 }
  0xbc   :  { %v233_v46 = vmax.f32 %v230_v45, 0.0 }
  0xbe   :  { %306 = vmatmul.f32.vlgmr.msrb.gmra.mxu1 %v233_v46 }
 0x137   :  { %v287_v48 = vpop.f32.mrf.mxu0 }
 0x138   :  { %v288_v49 = vadd.f32 %v339_v47, %v287_v48 }
 0x13b   :  { %v307_v50 = vpop.f32.mrf.mxu1 }
 0x13c   :  { %v308_v51 = vadd.f32 %v307_v50, %v288_v49 }
 0x13e   :  { %310 = vst [vmem:[#allocation10] sm:$0xff] %v308_v51 }
 0x13f   :  { %321 = dma.vmem_to_hbm [thread:$0]  %s317_s16, 128, %s319_s19, [#allocation4]  }
 0x140   :  { %466 = dma.done.wait [#allocation4], 128  }
 0x141   :  { %467 = vsyncadd [#allocation4], 4294967168 }
 0x142   :  { %326 = vsyncpa [#allocation3], 1 }
 0x143   :  { %327 = vsyncpa [#allocation6], 1 }
 0x144   :  { %328 = vsyncpa [#allocation9], 1 }
 0x145   :  { %329 = vsyncpa [#allocation4], 1 }

</bundles_post_ra>
